<compile_context>
chip_gen: v7x
topology: tpu7x:2x2x1
jax: 0.10.0
libtpu: 0.0.40
codegen_flags: <defaults>
</compile_context>

<pallas_src>
import jax
import jax.numpy as jnp
from jax.experimental import pallas as pl
from jax.experimental.pallas import tpu as pltpu


def _make_conv3x3_kernel(Cin, Cout, H, W):
    HW = H * W

    def kernel(x_ref, w_ref, o_ref, xcol_ref):
        # x_ref:    (Cin, H*W)     one image, channels on sublanes, flat spatial on lanes
        # w_ref:    (Cout, 9*Cin)  packed weight, tap-major / channel-minor rows
        # o_ref:    (Cout, H*W)    lane-dense output tile (already CHW order)
        # xcol_ref: (9*Cin, H*W)   VMEM scratch holding the im2col matrix
        xf = x_ref[...].astype(jnp.float32)

        # column index (w coordinate) of every flattened spatial position
        col = jax.lax.broadcasted_iota(jnp.int32, (1, HW), 1) % W

        # Build the im2col matrix: row block t = kh*3+kw holds x shifted by
        # (kh-1, kw-1), zero outside the image (this implements padding=1).
        xcol_ref[...] = jnp.zeros((9 * Cin, HW), jnp.float32)
        for kh in range(3):
            for kw in range(3):
                dh, dw = kh - 1, kw - 1
                t = kh * 3 + kw
                s = dh * W + dw                      # flat-index offset of this tap
                lo, hi = max(0, -s), min(HW, HW - s)  # output range with i+s in bounds
                window = xf[:, lo + s:hi + s]         # == x_flat[:, i + s] for i in [lo, hi)
                if dw != 0:
                    # mask out within-row wrap-around (w + dw outside [0, W))
                    c = col[:, lo:hi]
                    ok = (c + dw >= 0) & (c + dw < W)
                    window = jnp.where(ok, window, 0.0)
                xcol_ref[t * Cin:(t + 1) * Cin, lo:hi] = window

        # Single MXU matmul: (Cout, 9*Cin) x (9*Cin, H*W) -> (Cout, H*W)
        out = jnp.dot(w_ref[...].astype(jnp.float32), xcol_ref[...],
                      preferred_element_type=jnp.float32)
        o_ref[...] = out.astype(o_ref.dtype)

    return kernel


def overlap_patch_embed(x_nchw, weight_oihw):
    """Forward pass of OverlapPatchEmbed (3x3 conv, stride 1, pad 1, bias=False).

    x_nchw:      (B, Cin, H, W)
    weight_oihw: (Cout, Cin, 3, 3)   (PyTorch Conv2d weight layout)
    returns:     (B, Cout, H, W)
    """
    B, Cin, H, W = x_nchw.shape
    Cout = weight_oihw.shape[0]
    HW = H * W

    # Free (metadata-only) reshape: keep NCHW memory order, just flatten the
    # spatial dims so the kernel's lane axis is H*W. No transpose, no pad.
    x_flat = x_nchw.reshape(B, Cin, HW)

    # (Cout, Cin, kh, kw) -> (Cout, kh, kw, Cin) -> (Cout, 9*Cin); row order
    # matches the kernel's tap-major / channel-minor im2col rows.
    w_packed = jnp.transpose(weight_oihw, (0, 2, 3, 1)).reshape(Cout, 9 * Cin)
    w_packed = w_packed.astype(x_nchw.dtype)

    kernel = _make_conv3x3_kernel(Cin, Cout, H, W)

    # TODO(synk): for production image sizes, add an H-strip grid axis (with a
    # one-row halo) and re-derive block sizes for v7x's 64 MiB VMEM; at these
    # toy shapes a single image per grid step fits trivially.
    out_flat = pl.pallas_call(
        kernel,
        out_shape=jax.ShapeDtypeStruct((B, Cout, HW), x_nchw.dtype),
        grid_spec=pltpu.PrefetchScalarGridSpec(
            num_scalar_prefetch=0,
            grid=(B,),
            in_specs=[
                # one image per grid step (batch dim squeezed away)
                pl.BlockSpec((pl.Squeezed(), Cin, HW), lambda b: (b, 0, 0)),
                # packed 2D weight, resident across the grid
                pl.BlockSpec((Cout, 9 * Cin), lambda b: (0, 0)),
            ],
            out_specs=pl.BlockSpec((pl.Squeezed(), Cout, HW),
                                   lambda b: (b, 0, 0)),
            scratch_shapes=[pltpu.VMEM((9 * Cin, HW), jnp.float32)],
        ),
        compiler_params=pltpu.CompilerParams(
            dimension_semantics=("parallel",),
        ),
    )(x_flat, w_packed)

    # Free reshape back to the NCHW image form.
    return out_flat.reshape(B, Cout, H, W)


if __name__ == "__main__":
    # Small shapes consistent with the module: in_c=4, embed_dim=32.
    B, Cin, H, W = 2, 4, 16, 16
    Cout = 32

    key = jax.random.PRNGKey(0)
    kx, kw = jax.random.split(key)
    x = jax.random.normal(kx, (B, Cin, H, W), dtype=jnp.float32)
    # Deterministic weight init (PyTorch Conv2d weight shape: (Cout, Cin, 3, 3)),
    # scaled roughly like Kaiming uniform; bias=False in the module.
    fan_in = Cin * 3 * 3
    bound = (1.0 / fan_in) ** 0.5
    weight = jax.random.uniform(kw, (Cout, Cin, 3, 3),
                                dtype=jnp.float32, minval=-bound, maxval=bound)

    out = overlap_patch_embed(x, weight)
    out = jax.block_until_ready(out)

    # Reference check against XLA's conv (NCHW, OIHW, stride 1, pad 1).
    ref = jax.lax.conv_general_dilated(
        x, weight, window_strides=(1, 1), padding=((1, 1), (1, 1)),
        dimension_numbers=("NCHW", "OIHW", "NCHW"),
    )
    assert out.shape == (B, Cout, H, W)
    assert jnp.allclose(out, ref, atol=1e-4, rtol=1e-4)

    print("KERNEL_OK")
</pallas_src>

<mosaic_0001>
module attributes {stable_mosaic.version = 11 : i64} {
  func.func @kernel(%arg0: i32, %arg1: memref<1x4x256xf32, #tpu.memory_space<vmem>>, %arg2: memref<32x36xf32, #tpu.memory_space<vmem>>, %arg3: memref<1x32x256xf32, #tpu.memory_space<vmem>>, %arg4: memref<36x256xf32, #tpu.memory_space<vmem>>) attributes {dimension_semantics = [#tpu.dimension_semantics<parallel>], iteration_bounds = array<i64: 2>, scalar_prefetch = 0 : i64, scratch_operands = 1 : i64, tpu.core_type = #tpu.core_type<tc>, window_params = [{transform_indices = @transform_0, window_bounds = array<i64: 1, 4, 256>}, {pipeline_mode = #tpu.pipeline_mode<synchronous>, transform_indices = @transform_1, window_bounds = array<i64: 32, 36>}, {transform_indices = @transform_2, window_bounds = array<i64: 1, 32, 256>}]} {
    %c0 = arith.constant 0 : index
    %c0_0 = arith.constant 0 : index
    %c0_1 = arith.constant 0 : index
    %0 = vector.load %arg1[%c0, %c0_0, %c0_1] : memref<1x4x256xf32, #tpu.memory_space<vmem>>, vector<1x4x256xf32>
    %1 = vector.shape_cast %0 : vector<1x4x256xf32> to vector<4x256xf32>
    %2 = tpu.iota {dimensions = array<i32: 1>} : vector<1x256xi32>
    %c16_i32 = arith.constant 16 : i32
    %c0_i32 = arith.constant 0 : i32
    %3 = arith.cmpi eq, %c16_i32, %c0_i32 : i32
    %c1_i32 = arith.constant 1 : i32
    %4 = arith.select %3, %c1_i32, %c16_i32 : i32
    %5 = vector.broadcast %4 : i32 to vector<1x256xi32>
    %6 = arith.remsi %2, %5 : vector<1x256xi32>
    %c0_i32_2 = arith.constant 0 : i32
    %7 = vector.broadcast %c0_i32_2 : i32 to vector<1x256xi32>
    %8 = arith.cmpi ne, %6, %7 : vector<1x256xi32>
    %c0_i32_3 = arith.constant 0 : i32
    %9 = vector.broadcast %c0_i32_3 : i32 to vector<1x256xi32>
    %10 = arith.cmpi slt, %6, %9 : vector<1x256xi32>
    %c0_i32_4 = arith.constant 0 : i32
    %11 = arith.cmpi slt, %4, %c0_i32_4 : i32
    %12 = vector.broadcast %11 : i1 to vector<1x256xi1>
    %13 = vector.broadcast %12 : vector<1x256xi1> to vector<1x256xi1>
    %14 = arith.xori %10, %13 : vector<1x256xi1>
    %15 = arith.andi %14, %8 : vector<1x256xi1>
    %16 = vector.broadcast %4 : i32 to vector<1x256xi32>
    %17 = arith.addi %6, %16 : vector<1x256xi32>
    %18 = arith.select %15, %17, %6 : vector<1x256xi1>, vector<1x256xi32>
    %cst = arith.constant 0.000000e+00 : f32
    %19 = vector.broadcast %cst : f32 to vector<36x256xf32>
    %c0_5 = arith.constant 0 : index
    %c0_6 = arith.constant 0 : index
    %20 = vector.load %arg4[%c0_5, %c0_6] : memref<36x256xf32, #tpu.memory_space<vmem>>, vector<36x256xf32>
    tpu.vector_store %arg4[%c0_5, %c0_6], %19 {strides = array<i32>} : memref<36x256xf32, #tpu.memory_space<vmem>>, vector<36x256xf32>,
    %21 = vector.extract_strided_slice %1 {offsets = [0, 0], sizes = [4, 239], strides = [1, 1]} : vector<4x256xf32> to vector<4x239xf32>
    %22 = vector.extract_strided_slice %18 {offsets = [0, 17], sizes = [1, 239], strides = [1, 1]} : vector<1x256xi32> to vector<1x239xi32>
    %c-1_i32 = arith.constant -1 : i32
    %23 = vector.broadcast %c-1_i32 : i32 to vector<1x239xi32>
    %24 = arith.addi %22, %23 : vector<1x239xi32>
    %c0_i32_7 = arith.constant 0 : i32
    %25 = vector.broadcast %c0_i32_7 : i32 to vector<1x239xi32>
    %26 = arith.cmpi sge, %24, %25 : vector<1x239xi32>
    %c-1_i32_8 = arith.constant -1 : i32
    %27 = vector.broadcast %c-1_i32_8 : i32 to vector<1x239xi32>
    %28 = arith.addi %22, %27 : vector<1x239xi32>
    %c16_i32_9 = arith.constant 16 : i32
    %29 = vector.broadcast %c16_i32_9 : i32 to vector<1x239xi32>
    %30 = arith.cmpi slt, %28, %29 : vector<1x239xi32>
    %31 = arith.andi %26, %30 : vector<1x239xi1>
    %cst_10 = arith.constant 0.000000e+00 : f32
    %32 = vector.shape_cast %31 : vector<1x239xi1> to vector<1x239xi1>
    %33 = vector.broadcast %32 : vector<1x239xi1> to vector<4x239xi1>
    %34 = vector.broadcast %cst_10 : f32 to vector<4x239xf32>
    %35 = arith.select %33, %21, %34 : vector<4x239xi1>, vector<4x239xf32>
    %c0_11 = arith.constant 0 : index
    %c17 = arith.constant 17 : index
    %36 = vector.load %arg4[%c0_11, %c17] : memref<36x256xf32, #tpu.memory_space<vmem>>, vector<4x239xf32>
    tpu.vector_store %arg4[%c0_11, %c17], %35 {strides = array<i32>} : memref<36x256xf32, #tpu.memory_space<vmem>>, vector<4x239xf32>,
    %37 = vector.extract_strided_slice %1 {offsets = [0, 0], sizes = [4, 240], strides = [1, 1]} : vector<4x256xf32> to vector<4x240xf32>
    %c4 = arith.constant 4 : index
    %c16 = arith.constant 16 : index
    %38 = vector.load %arg4[%c4, %c16] : memref<36x256xf32, #tpu.memory_space<vmem>>, vector<4x240xf32>
    tpu.vector_store %arg4[%c4, %c16], %37 {strides = array<i32>} : memref<36x256xf32, #tpu.memory_space<vmem>>, vector<4x240xf32>,
    %39 = vector.extract_strided_slice %1 {offsets = [0, 0], sizes = [4, 241], strides = [1, 1]} : vector<4x256xf32> to vector<4x241xf32>
    %40 = vector.extract_strided_slice %18 {offsets = [0, 15], sizes = [1, 241], strides = [1, 1]} : vector<1x256xi32> to vector<1x241xi32>
    %c1_i32_12 = arith.constant 1 : i32
    %41 = vector.broadcast %c1_i32_12 : i32 to vector<1x241xi32>
    %42 = arith.addi %40, %41 : vector<1x241xi32>
    %c0_i32_13 = arith.constant 0 : i32
    %43 = vector.broadcast %c0_i32_13 : i32 to vector<1x241xi32>
    %44 = arith.cmpi sge, %42, %43 : vector<1x241xi32>
    %c1_i32_14 = arith.constant 1 : i32
    %45 = vector.broadcast %c1_i32_14 : i32 to vector<1x241xi32>
    %46 = arith.addi %40, %45 : vector<1x241xi32>
    %c16_i32_15 = arith.constant 16 : i32
    %47 = vector.broadcast %c16_i32_15 : i32 to vector<1x241xi32>
    %48 = arith.cmpi slt, %46, %47 : vector<1x241xi32>
    %49 = arith.andi %44, %48 : vector<1x241xi1>
    %cst_16 = arith.constant 0.000000e+00 : f32
    %50 = vector.shape_cast %49 : vector<1x241xi1> to vector<1x241xi1>
    %51 = vector.broadcast %50 : vector<1x241xi1> to vector<4x241xi1>
    %52 = vector.broadcast %cst_16 : f32 to vector<4x241xf32>
    %53 = arith.select %51, %39, %52 : vector<4x241xi1>, vector<4x241xf32>
    %c8 = arith.constant 8 : index
    %c15 = arith.constant 15 : index
    %54 = vector.load %arg4[%c8, %c15] : memref<36x256xf32, #tpu.memory_space<vmem>>, vector<4x241xf32>
    tpu.vector_store %arg4[%c8, %c15], %53 {strides = array<i32>} : memref<36x256xf32, #tpu.memory_space<vmem>>, vector<4x241xf32>,
    %55 = vector.extract_strided_slice %1 {offsets = [0, 0], sizes = [4, 255], strides = [1, 1]} : vector<4x256xf32> to vector<4x255xf32>
    %56 = vector.extract_strided_slice %18 {offsets = [0, 1], sizes = [1, 255], strides = [1, 1]} : vector<1x256xi32> to vector<1x255xi32>
    %c-1_i32_17 = arith.constant -1 : i32
    %57 = vector.broadcast %c-1_i32_17 : i32 to vector<1x255xi32>
    %58 = arith.addi %56, %57 : vector<1x255xi32>
    %c0_i32_18 = arith.constant 0 : i32
    %59 = vector.broadcast %c0_i32_18 : i32 to vector<1x255xi32>
    %60 = arith.cmpi sge, %58, %59 : vector<1x255xi32>
    %c-1_i32_19 = arith.constant -1 : i32
    %61 = vector.broadcast %c-1_i32_19 : i32 to vector<1x255xi32>
    %62 = arith.addi %56, %61 : vector<1x255xi32>
    %c16_i32_20 = arith.constant 16 : i32
    %63 = vector.broadcast %c16_i32_20 : i32 to vector<1x255xi32>
    %64 = arith.cmpi slt, %62, %63 : vector<1x255xi32>
    %65 = arith.andi %60, %64 : vector<1x255xi1>
    %cst_21 = arith.constant 0.000000e+00 : f32
    %66 = vector.shape_cast %65 : vector<1x255xi1> to vector<1x255xi1>
    %67 = vector.broadcast %66 : vector<1x255xi1> to vector<4x255xi1>
    %68 = vector.broadcast %cst_21 : f32 to vector<4x255xf32>
    %69 = arith.select %67, %55, %68 : vector<4x255xi1>, vector<4x255xf32>
    %c12 = arith.constant 12 : index
    %c1 = arith.constant 1 : index
    %70 = vector.load %arg4[%c12, %c1] : memref<36x256xf32, #tpu.memory_space<vmem>>, vector<4x255xf32>
    tpu.vector_store %arg4[%c12, %c1], %69 {strides = array<i32>} : memref<36x256xf32, #tpu.memory_space<vmem>>, vector<4x255xf32>,
    %c16_22 = arith.constant 16 : index
    %c0_23 = arith.constant 0 : index
    %71 = vector.load %arg4[%c16_22, %c0_23] : memref<36x256xf32, #tpu.memory_space<vmem>>, vector<4x256xf32>
    tpu.vector_store %arg4[%c16_22, %c0_23], %1 {strides = array<i32>} : memref<36x256xf32, #tpu.memory_space<vmem>>, vector<4x256xf32>,
    %72 = vector.extract_strided_slice %1 {offsets = [0, 1], sizes = [4, 255], strides = [1, 1]} : vector<4x256xf32> to vector<4x255xf32>
    %73 = vector.extract_strided_slice %18 {offsets = [0, 0], sizes = [1, 255], strides = [1, 1]} : vector<1x256xi32> to vector<1x255xi32>
    %c1_i32_24 = arith.constant 1 : i32
    %74 = vector.broadcast %c1_i32_24 : i32 to vector<1x255xi32>
    %75 = arith.addi %73, %74 : vector<1x255xi32>
    %c0_i32_25 = arith.constant 0 : i32
    %76 = vector.broadcast %c0_i32_25 : i32 to vector<1x255xi32>
    %77 = arith.cmpi sge, %75, %76 : vector<1x255xi32>
    %c1_i32_26 = arith.constant 1 : i32
    %78 = vector.broadcast %c1_i32_26 : i32 to vector<1x255xi32>
    %79 = arith.addi %73, %78 : vector<1x255xi32>
    %c16_i32_27 = arith.constant 16 : i32
    %80 = vector.broadcast %c16_i32_27 : i32 to vector<1x255xi32>
    %81 = arith.cmpi slt, %79, %80 : vector<1x255xi32>
    %82 = arith.andi %77, %81 : vector<1x255xi1>
    %cst_28 = arith.constant 0.000000e+00 : f32
    %83 = vector.shape_cast %82 : vector<1x255xi1> to vector<1x255xi1>
    %84 = vector.broadcast %83 : vector<1x255xi1> to vector<4x255xi1>
    %85 = vector.broadcast %cst_28 : f32 to vector<4x255xf32>
    %86 = arith.select %84, %72, %85 : vector<4x255xi1>, vector<4x255xf32>
    %c20 = arith.constant 20 : index
    %c0_29 = arith.constant 0 : index
    %87 = vector.load %arg4[%c20, %c0_29] : memref<36x256xf32, #tpu.memory_space<vmem>>, vector<4x255xf32>
    tpu.vector_store %arg4[%c20, %c0_29], %86 {strides = array<i32>} : memref<36x256xf32, #tpu.memory_space<vmem>>, vector<4x255xf32>,
    %88 = vector.extract_strided_slice %1 {offsets = [0, 15], sizes = [4, 241], strides = [1, 1]} : vector<4x256xf32> to vector<4x241xf32>
    %89 = vector.extract_strided_slice %18 {offsets = [0, 0], sizes = [1, 241], strides = [1, 1]} : vector<1x256xi32> to vector<1x241xi32>
    %c-1_i32_30 = arith.constant -1 : i32
    %90 = vector.broadcast %c-1_i32_30 : i32 to vector<1x241xi32>
    %91 = arith.addi %89, %90 : vector<1x241xi32>
    %c0_i32_31 = arith.constant 0 : i32
    %92 = vector.broadcast %c0_i32_31 : i32 to vector<1x241xi32>
    %93 = arith.cmpi sge, %91, %92 : vector<1x241xi32>
    %c-1_i32_32 = arith.constant -1 : i32
    %94 = vector.broadcast %c-1_i32_32 : i32 to vector<1x241xi32>
    %95 = arith.addi %89, %94 : vector<1x241xi32>
    %c16_i32_33 = arith.constant 16 : i32
    %96 = vector.broadcast %c16_i32_33 : i32 to vector<1x241xi32>
    %97 = arith.cmpi slt, %95, %96 : vector<1x241xi32>
    %98 = arith.andi %93, %97 : vector<1x241xi1>
    %cst_34 = arith.constant 0.000000e+00 : f32
    %99 = vector.shape_cast %98 : vector<1x241xi1> to vector<1x241xi1>
    %100 = vector.broadcast %99 : vector<1x241xi1> to vector<4x241xi1>
    %101 = vector.broadcast %cst_34 : f32 to vector<4x241xf32>
    %102 = arith.select %100, %88, %101 : vector<4x241xi1>, vector<4x241xf32>
    %c24 = arith.constant 24 : index
    %c0_35 = arith.constant 0 : index
    %103 = vector.load %arg4[%c24, %c0_35] : memref<36x256xf32, #tpu.memory_space<vmem>>, vector<4x241xf32>
    tpu.vector_store %arg4[%c24, %c0_35], %102 {strides = array<i32>} : memref<36x256xf32, #tpu.memory_space<vmem>>, vector<4x241xf32>,
    %104 = vector.extract_strided_slice %1 {offsets = [0, 16], sizes = [4, 240], strides = [1, 1]} : vector<4x256xf32> to vector<4x240xf32>
    %c28 = arith.constant 28 : index
    %c0_36 = arith.constant 0 : index
    %105 = vector.load %arg4[%c28, %c0_36] : memref<36x256xf32, #tpu.memory_space<vmem>>, vector<4x240xf32>
    tpu.vector_store %arg4[%c28, %c0_36], %104 {strides = array<i32>} : memref<36x256xf32, #tpu.memory_space<vmem>>, vector<4x240xf32>,
    %106 = vector.extract_strided_slice %1 {offsets = [0, 17], sizes = [4, 239], strides = [1, 1]} : vector<4x256xf32> to vector<4x239xf32>
    %107 = vector.extract_strided_slice %18 {offsets = [0, 0], sizes = [1, 239], strides = [1, 1]} : vector<1x256xi32> to vector<1x239xi32>
    %c1_i32_37 = arith.constant 1 : i32
    %108 = vector.broadcast %c1_i32_37 : i32 to vector<1x239xi32>
    %109 = arith.addi %107, %108 : vector<1x239xi32>
    %c0_i32_38 = arith.constant 0 : i32
    %110 = vector.broadcast %c0_i32_38 : i32 to vector<1x239xi32>
    %111 = arith.cmpi sge, %109, %110 : vector<1x239xi32>
    %c1_i32_39 = arith.constant 1 : i32
    %112 = vector.broadcast %c1_i32_39 : i32 to vector<1x239xi32>
    %113 = arith.addi %107, %112 : vector<1x239xi32>
    %c16_i32_40 = arith.constant 16 : i32
    %114 = vector.broadcast %c16_i32_40 : i32 to vector<1x239xi32>
    %115 = arith.cmpi slt, %113, %114 : vector<1x239xi32>
    %116 = arith.andi %111, %115 : vector<1x239xi1>
    %cst_41 = arith.constant 0.000000e+00 : f32
    %117 = vector.shape_cast %116 : vector<1x239xi1> to vector<1x239xi1>
    %118 = vector.broadcast %117 : vector<1x239xi1> to vector<4x239xi1>
    %119 = vector.broadcast %cst_41 : f32 to vector<4x239xf32>
    %120 = arith.select %118, %106, %119 : vector<4x239xi1>, vector<4x239xf32>
    %c32 = arith.constant 32 : index
    %c0_42 = arith.constant 0 : index
    %121 = vector.load %arg4[%c32, %c0_42] : memref<36x256xf32, #tpu.memory_space<vmem>>, vector<4x239xf32>
    tpu.vector_store %arg4[%c32, %c0_42], %120 {strides = array<i32>} : memref<36x256xf32, #tpu.memory_space<vmem>>, vector<4x239xf32>,
    %c0_43 = arith.constant 0 : index
    %c0_44 = arith.constant 0 : index
    %122 = vector.load %arg2[%c0_43, %c0_44] : memref<32x36xf32, #tpu.memory_space<vmem>>, vector<32x36xf32>
    %c0_45 = arith.constant 0 : index
    %c0_46 = arith.constant 0 : index
    %123 = vector.load %arg4[%c0_45, %c0_46] : memref<36x256xf32, #tpu.memory_space<vmem>>, vector<36x256xf32>
    %cst_47 = arith.constant dense<0.000000e+00> : vector<32x256xf32>
    %124 = tpu.matmul %122, %123, %cst_47 {dimension_numbers = #tpu.dot_dimension_numbers<[1], [0], [0], [1], [0, 0, 1, 1], [], []>} : vector<32x36xf32>, vector<36x256xf32>, vector<32x256xf32> -> vector<32x256xf32>
    %c0_48 = arith.constant 0 : index
    %c0_49 = arith.constant 0 : index
    %c0_50 = arith.constant 0 : index
    %125 = vector.load %arg3[%c0_48, %c0_49, %c0_50] : memref<1x32x256xf32, #tpu.memory_space<vmem>>, vector<1x32x256xf32>
    %126 = vector.shape_cast %125 : vector<1x32x256xf32> to vector<32x256xf32>
    %127 = vector.shape_cast %124 : vector<32x256xf32> to vector<1x32x256xf32>
    tpu.vector_store %arg3[%c0_48, %c0_49, %c0_50], %127 {strides = array<i32>} : memref<1x32x256xf32, #tpu.memory_space<vmem>>, vector<1x32x256xf32>,
    return
  }
  func.func @transform_0(%arg0: i32) -> (i32, i32, i32) {
    %c0_i32 = arith.constant 0 : i32
    %c0_i32_0 = arith.constant 0 : i32
    %c0_i32_1 = arith.constant 0 : i32
    return %arg0, %c0_i32, %c0_i32_0 : i32, i32, i32
  }
  func.func @transform_1(%arg0: i32) -> (i32, i32) {
    %c0_i32 = arith.constant 0 : i32
    %c0_i32_0 = arith.constant 0 : i32
    %c0_i32_1 = arith.constant 0 : i32
    return %c0_i32, %c0_i32_0 : i32, i32
  }
  func.func @transform_2(%arg0: i32) -> (i32, i32, i32) {
    %c0_i32 = arith.constant 0 : i32
    %c0_i32_0 = arith.constant 0 : i32
    %c0_i32_1 = arith.constant 0 : i32
    return %arg0, %c0_i32, %c0_i32_0 : i32, i32, i32
  }
}

</mosaic_0001>

<bundles_post_ra>
// kernel: tpu_custom_call.1
= control target key start
LH: loop header
LB: loop body
LE: loop exit
PB: predicated region body
PF: predicated region fallthrough
CT: control target
= control target key end

     0   :  { %7 = vsyncpa [#allocation4], 0  ;;  %s1098_s0 = inlined_call_operand.hbm [shape: f32[2,4,256], index: 0, kind: input, shape index: {}]   ;;  %s1099_s1 = inlined_call_operand.hbm [shape: f32[32,36], index: 1, kind: input, shape index: {}]   ;;  %s1100_s2 = inlined_call_operand.hbm [shape: f32[2,32,256], index: 2, kind: output, shape index: {}]  }
   0x1   :  { %9 = vsyncpa [#allocation4 + $0x1], 0 }
   0x2   :  { %10 = vsyncpa [#allocation7], 0 }
   0x3   :  { %11 = vsyncpa [#allocation5], 0 }
   0x4   :  { %13 = vsyncpa [#allocation5 + $0x1], 0  ;;  %s852_s9 = smov 0   ;;  %s854_s10 = smov 0  }
   0x5   :  { %s856_s11 = smov 0   ;;  %s858_s12 = smov 0  }
   0x6 LB: > { %s873_s13 = sadd.s32 4294967295, %s820_s12   ;;  %s583_s14 = sadd.s32 4294967294, %s820_s12   ;;  %s820_s12 = sphi %s858_s12, %s1120_s12   ;;  %s816_s11 = sphi %s856_s11, %s1119_s11   ;;  %s812_s10 = sphi %s854_s10, %s1118_s10   ;;  %s808_s9 = sphi %s852_s9, %s1117_s9  }
   0x7   : > { %p39_p0 = scmp.ne.s32.totalorder %s812_s10, %s808_s9  ;;  %p1101_p1 = scmp.eq.s32.totalorder %s873_s13, 0 }
   0x8   : > { %p90_p3 = scmp.eq.s32.totalorder %s583_s14, 1  ;;  %p584_p5 = scmp.ge.s32.totalorder %s820_s12, 1 }
   0x9   : > { %p882_p4 = por %p1101_p1, %p39_p0  ;;  %p97_p7 = scmp.lt.s32.totalorder %s820_s12, 3 }
   0xa   : > { %p887_p6 = por %p90_p3, %p39_p0  ;;  %s822_s18 = smov [#allocation6]  }
   0xb   : > { %s1104_s15 = scalar_select %p882_p4, 1, 0 }
   0xc   : > { %s1105_s16 = scalar_select %p887_p6, 1, 0 }
   0xd   : > { %p892_p8 = pnand %p584_p5, %p97_p7  ;;  %s109_s19 = sshll.u32 %s822_s18, 4  ;;  %s896_s19 = int_to_ptr.vmem [resolvable:$true] %s109_s19 }
   0xe   : > { %s908_s21 = sadd.s32 1, %s820_s12   ;;  %s26_s22 = sadd.s32 1, %s816_s11 }
   0xf   : > { %s1106_s17 = scalar_select %p892_p8, 1, 0 }
  0x10   : > { %p629_p9 = pneg %p892_p8  ;;  %s23_s23 = ssub.s32 %s820_s12, %s908_s21 }
  0x11   : > { %s692_s26 = scalar_lea.hbm %s1099_s1, 512 }
  0x12   : > { %p903_p11 = pnand %p629_p9, %p1101_p1  ;;  %p693_p12 = scmp.ne.s32.totalorder %s1099_s1, %s692_s26 }
  0x13   : > { %p699_p5 = scmp.lt.u32.totalorder %s692_s26, %s1099_s1 }
  0x14   : > { %p694_p13 = pneg %p903_p11 }
  0x16   : > { %p695_p0 = pnand %p694_p13, %p693_p12 }
  0x18   : > { %p696_p3 = pneg %p695_p0 }
  0x1a   : > { %p701_p7 = pnand %p699_p5, %p696_p3 }
  0x1c   : > { %704 = shalt.err (!%p701_p7)
}
  0x1d   : > { %s705_s3 = scalar_lea.vmem %s896_s19, 512  ;;  %p713_p2 = scmp.lt.s32.totalorder %s896_s19, %s896_s19 }
  0x1e   : > { %p706_p9 = scmp.ne.s32.totalorder %s896_s19, %s705_s3  ;;  %p714_p6 = scmp.lt.s32.totalorder %s705_s3, %s705_s3 }
  0x20   : > { %p708_p10 = pnand %p706_p9, %p694_p13  ;;  %p715_p4 = por %p714_p6, %p713_p2 }
  0x22   : > { %p709_p1 = pneg %p708_p10 }
  0x24   : > { %p716_p8 = pnand %p715_p4, %p709_p1 }
  0x26   : > { %719 = shalt.err (!%p716_p8)
}
  0x27   : > { %s823_s4 = smov 128   ;;  %s824_s5 = smov 8  }
  0x28   : > { %632 = dma.hbm_to_vmem [thread:$0]  (!%p903_p11), %s1099_s1, 512, %s896_s19, [#allocation7], %s823_s4, %s823_s4, %s824_s5  }
  0x29   : > { %p24_p2 = scmp.eq.s32.totalorder %s23_s23, 0  ;;  %p33_p1 = scmp.ne.s32.totalorder %s816_s11, %s812_s10 }
  0x2a   : > { %p34_p4 = scmp.eq.s32.totalorder %s820_s12, 0  ;;  %p642_p6 = scmp.lt.s32.totalorder %s820_s12, 2 }
  0x2b   : > { %s939_s8 = scalar_select %p24_p2, %s816_s11, %s26_s22  }
  0x2c   : > { %p35_p8 = por %p34_p4, %p33_p1  ;;  %p1108_p10 = scmp.eq.s32.totalorder %s873_s13, 1 }
  0x2d   : > { %s123_s18 = sand.u32 1, %s816_s11   ;;  %s605_s24 = sshll.u32 %s820_s12, 7 }
  0x2e   : > { %p943_p12 = por %p1108_p10, %p33_p1  ;;  %s587_s25 = sshll.u32 %s123_s18, 3 }
  0x2f   : > { %s952_s27 = scalar_lea.hbm %s1098_s0, %s605_s24  ;;  %s127_s19 = scalar_lea.vmem [#allocation3], %s587_s25 }
  0x30   : > { %s135_s22 = sshll.u32 %s127_s19, 4  ;;  %p954_p11 = pnand %p642_p6, %p35_p8  ;;  %s958_s22 = int_to_ptr.vmem [resolvable:$true] %s135_s22 }
  0x31   : > { %s124_s28 = scalar_lea.sflag [#allocation4], %s123_s18  ;;  %s720_s29 = scalar_lea.hbm %s952_s27, 128 }
  0x32   : > { %p721_p13 = scmp.ne.s32.totalorder %s952_s27, %s720_s29  ;;  %p722_p0 = pneg %p954_p11 }
  0x33   : > { %s725_s4 = scalar_lea.hbm %s1098_s0, 256  ;;  %p726_p7 = scmp.lt.u32.totalorder %s952_s27, %s1098_s0 }
  0x34   : > { %p723_p3 = pnand %p722_p0, %p721_p13  ;;  %p727_p9 = scmp.lt.u32.totalorder %s725_s4, %s720_s29 }
  0x35   : > { %p729_p1 = scmp.lt.u32.totalorder %s720_s29, %s952_s27 }
  0x36   : > { %p724_p5 = pneg %p723_p3  ;;  %p728_p2 = por %p727_p9, %p726_p7 }
  0x38   : > { %p730_p4 = por %p729_p1, %p728_p2 }
  0x3a   : > { %p731_p6 = pnand %p730_p4, %p724_p5 }
  0x3c   : > { %734 = shalt.err (!%p731_p6)
}
  0x3d   : > { %s735_s7 = scalar_lea.vmem %s958_s22, 128  ;;  %s825_s18 = smov [#allocation3]  }
  0x3e   : > { %p736_p8 = scmp.ne.s32.totalorder %s958_s22, %s735_s7  ;;  %s740_s24 = sshll.u32 %s825_s18, 4  ;;  %s741_s24 = int_to_ptr.vmem [resolvable:$false] %s740_s24 }
  0x3f   : > { %s742_s25 = scalar_lea.vmem %s741_s24, 256  ;;  %p743_p3 = scmp.lt.s32.totalorder %s958_s22, %s741_s24 }
  0x40   : > { %p738_p10 = pnand %p736_p8, %p722_p0  ;;  %p744_p7 = scmp.lt.s32.totalorder %s742_s25, %s735_s7 }
  0x42   : > { %p739_p13 = pneg %p738_p10  ;;  %p745_p9 = por %p744_p7, %p743_p3 }
  0x44   : > { %p746_p2 = pnand %p745_p9, %p739_p13 }
  0x46   : > { %749 = shalt.err (!%p746_p2)
}
  0x47   : > { %636 = dma.hbm_to_vmem [thread:$0]  (!%p954_p11), %s952_s27, 128, %s958_s22, %s124_s28  }
  0x48   : > { %p1111_p5 = scmp.ne.s32.totalorder %s1106_s17, 0 }
  0x49   : > { %s988_s20 = sand.u32 (!%p1111_p5), 1, %s812_s10   ;;  %p1112_p0 = scmp.ne.s32.totalorder (!%p1111_p5), %s1104_s15, 0 }
  0x4a   : > { %144 = sbr.rel (%p1111_p5) target bundleno = 474 (0x1da), region = 28  ;;  %s591_s26 = sshll.u32 (!%p1111_p5), %s988_s20, 3 }
  0x4b   : > { %s147_s19 = scalar_lea.sflag (!%p1111_p5), [#allocation4], %s988_s20  ;;  %s150_s29 = scalar_lea.vmem (!%p1111_p5), [#allocation3], %s591_s26 }
  0x51   : > { %795 = dma.done.wait (%p1112_p0), %s147_s19, 128  }
  0x52   : > { %797 = vsyncadd (%p1112_p0), %s147_s19, 4294967168  ;;  %p1113_p1 = scmp.eq.s32.totalorder %s873_s13, 0 }
  0x54   : > { %799 = dma.done.wait (%p1113_p1), [#allocation7], 512   ;;  %p1114_p11 = pmov %p1113_p1 }
  0x55   : > { %v826_v0 = vmov 0.0   ;;  %v175_v1 = vld [vmem:[%s150_s29] sm:$0xff]  ;;  %s827_s15 = smov 17   ;;  %s828_s17 = smov 1   ;;  %v176_v4 = vlaneseq  ;;  %vm237_vm1 = vcmask 1043592   ;;  %vm293_vm2 = vcmask 1047564  }
  0x56   : > { %801 = vsyncadd (%p1114_p11), [#allocation7], 4294966784  ;;  %203 = vst [vmem:[#allocation2] sm:$0xff] %v826_v0  ;;  %453 = vmatprep.mubr.f32.mxu0 %v826_v0  ;;  %465 = vmatprep.mubr.f32.mxu1 %v826_v0  ;;  %v226_v2 = vcombine.high %v175_v1, %v175_v1  ;;  %s829_s27 = smov 15   ;;  %v240_v3 = vcombine.low %v175_v1, %v175_v1  ;;  %s830_s22 = smov 16   ;;  %vm231_vm4 = vcmask 138240  }
  0x57   : > { %204 = vst [vmem:[#allocation2 + $0x8] sm:$0xff] %v826_v0  ;;  %205 = vst [vmem:[#allocation2 + $0x10] sm:$0xff] %v826_v0  ;;  %227 = vrot.lane.b32.xlu1 %v175_v1, %s827_s15  ;;  %277 = vrot.lane.b32.xlu0 %v175_v1, %s828_s17  ;;  %s831_s23 = smov 127   ;;  %s832_s28 = smov 113   ;;  %v177_v5 = vand.u32 127, %v176_v4  ;;  %vm274_vm5 = vcmask 1043576  }
  0x58   : > { %206 = vst [vmem:[#allocation2 + $0x18] sm:$0xff] %v826_v0  ;;  %207 = vst [vmem:[#allocation2 + $0x20] sm:$0xff] %v826_v0  ;;  %s833_s30 = smov 112   ;;  %s834_s3 = smov 111   ;;  %vm268_vm7 = vcmask 121856   ;;  %vm281_vm8 = vcmask 7168  }
  0x59   : > { %208 = vst [vmem:[#allocation2 + $0x28] sm:$0xff] %v826_v0  ;;  %209 = vst [vmem:[#allocation2 + $0x30] sm:$0xff] %v826_v0  ;;  %v183_v6 = vand.u32 15, %v177_v5  ;;  %v178_v7 = vadd.s32 128, %v177_v5  ;;  %vm245_vm10 = vcmask 130048   ;;  %vm249_vm11 = vcmask 1047684  }
  0x5a   : > { %210 = vst [vmem:[#allocation2 + $0x38] sm:$0xff] %v826_v0  ;;  %211 = vst [vmem:[#allocation2 + $0x40] sm:$0xf] %v826_v0  ;;  %vm303_vm12 = vcmask 1039360   ;;  %vm316_vm13 = vcmask 1039364   ;;  %vm322_vm14 = vcmask 924672  }
  0x5b   : > { %212 = vst [vmem:[#allocation2 + $0x48] sm:$0xf] %v826_v0  ;;  %297 = vst [vmem:[#allocation2 + $0x20] sm:$0xf] %v175_v1  ;;  %264 = vrot.lane.b32.xlu0 %v175_v1, %s829_s27  ;;  %229 = vrot.lane.b32.xlu1 %v226_v2, %s827_s15  ;;  %v1014_v8 = vadd.s32 4294967295, %v183_v6  ;;  %v190_v9 = vand.u32 15, %v178_v7 }
  0x5c   : > { %298 = vst [vmem:[#allocation2 + $0x28] sm:$0xf] %v226_v2  ;;  %v1017_v10 = vadd.s32 1, %v183_v6  ;;  %vm329_vm15 = vcmask 920576   ;;  %v355_v4 = vld [vmem:[#allocation6] sm:$0xff]  ;;  %v357_v5 = vld [vmem:[#allocation6 + $0x10] sm:$0xff] }
  0x5d   : > { %vm215_vm0 = vcmp.ge.s32.totalorder %v1014_v8, 0  ;;  %v214_v11 = vadd.s32 4294967295, %v190_v9  ;;  %v1024_v17 = vadd.s32 1, %v190_v9  ;;  %v356_v6 = vld [vmem:[#allocation6 + $0x8] sm:$0xff]  ;;  %v358_v7 = vld [vmem:[#allocation6 + $0x18] sm:$0xff]  ;;  %s593_s4 = sshll.u32 %s988_s20, 6 }
  0x5e   : > { %vm256_vm3 = vcmp.lt.s32.totalorder %v1017_v10, 16  ;;  %s174_s5 = scalar_lea.vmem [#allocation8], %s593_s4  ;;  %s606_s7 = sshll.u32 %s873_s13, 10 }
  0x5f   : > { %266 = vrot.lane.b32.xlu1 %v226_v2, %s829_s27  ;;  %279 = vrot.lane.b32.xlu0 %v226_v2, %s828_s17  ;;  %vm216_vm6 = vcmp.ge.s32.totalorder %v214_v11, 0  ;;  %vm257_vm9 = vcmp.lt.s32.totalorder %v1024_v17, 16  ;;  %s500_s6 = sshll.u32 %s174_s5, 4  ;;  %s1053_s25 = scalar_lea.hbm %s1100_s2, %s606_s7  ;;  %s1048_s6 = int_to_ptr.vmem [resolvable:$true] %s500_s6 }
  0x60   : > { %s487_s13 = scalar_lea.sflag [#allocation5], %s988_s20  ;;  %s750_s26 = scalar_lea.vmem %s1048_s6, 1024 }
  0x61   : > { %p751_p4 = scmp.ne.s32.totalorder %s1048_s6, %s750_s26  ;;  %s835_s19 = smov [#allocation8]  }
  0x62   : > { %s754_s29 = sshll.u32 %s835_s19, 4  ;;  %s755_s29 = int_to_ptr.vmem [resolvable:$false] %s754_s29 }
  0x63   : > { %243 = vrot.lane.b32.xlu1 %v175_v1, %s830_s22  ;;  %241 = vrot.lane.b32.xlu0 %v240_v3, %s830_s22  ;;  %p752_p6 = pnand %p751_p4, %p943_p12  ;;  %s756_s15 = scalar_lea.vmem %s755_s29, 2048 }
  0x64   : > { %p757_p10 = scmp.lt.s32.totalorder %s1048_s6, %s755_s29  ;;  %p758_p13 = scmp.lt.s32.totalorder %s756_s15, %s750_s26 }
  0x65   : > { %p753_p8 = pneg %p752_p6 }
  0x66   : > { %p759_p3 = por %p758_p13, %p757_p10 }
  0x67   : > { %301 = vrot.lane.b32.xlu1 %v226_v2, %s831_s23  ;;  %299 = vrot.lane.b32.xlu0 %v175_v1, %s831_s23 }
  0x68   : > { %p760_p7 = pnand %p759_p3, %p753_p8 }
  0x6b   : > { %320 = vrot.lane.b32.xlu1 %v226_v2, %s832_s28  ;;  %318 = vrot.lane.b32.xlu0 %v175_v1, %s832_s28 }
  0x6f   : > { %333 = vrot.lane.b32.xlu1 %v175_v1, %s833_s30  ;;  %331 = vrot.lane.b32.xlu0 %v240_v3, %s833_s30 }
  0x73   : > { %344 = vrot.lane.b32.xlu1 %v226_v2, %s834_s3  ;;  %342 = vrot.lane.b32.xlu0 %v175_v1, %s834_s3 }
  0xc9   : > { %v228_v12 = vpop.permute.xlu1 %227  ;;  %v278_v13 = vpop.permute.xlu0 %277 }
  0xca   : > { %v235_v14 = vsel %vm215_vm0, %v228_v12, 0.0  ;;  %v285_v15 = vsel %vm215_vm0, %v278_v13, 0.0 }
  0xcb   : > { %238 = vst.msk [vmem:[#allocation2] sm:$0xf] %vm237_vm1, %v235_v14  ;;  %v289_v16 = vrot.slane %v285_v15, 4  ;;  %vm340_vm1 = vcmask 916484  }
  0xcd   : > { %294 = vst.msk [vmem:[#allocation2 + $0x10] sm:$0xf0] %vm293_vm2, %v289_v16  ;;  %v265_v18 = vpop.permute.xlu0 %264  ;;  %v230_v19 = vpop.permute.xlu1 %229  ;;  %vm335_vm2 = vcmask 916480  }
  0xce   : > { %v272_v20 = vsel %vm256_vm3, %v265_v18, 0.0  ;;  %v232_v21 = vsel %vm231_vm4, %v228_v12, %v230_v19  ;;  %vm346_vm4 = vcmask 908288  }
  0xcf   : > { %275 = vst.msk [vmem:[#allocation2 + $0x10] sm:$0xf] %vm274_vm5, %v272_v20  ;;  %v236_v22 = vsel %vm216_vm6, %v232_v21, 0.0  ;;  %vm353_vm5 = vcmask 904192  }
  0xd0   : > { %239 = vst [vmem:[#allocation2 + $0x8] sm:$0xf] %v236_v22 }
  0xd1   : > { %v267_v23 = vpop.permute.xlu1 %266  ;;  %v280_v24 = vpop.permute.xlu0 %279 }
  0xd2   : > { %v269_v25 = vsel %vm268_vm7, %v265_v18, %v267_v23  ;;  %v282_v26 = vsel %vm281_vm8, %v278_v13, %v280_v24 }
  0xd3   : > { %v273_v27 = vsel %vm257_vm9, %v269_v25, 0.0  ;;  %v286_v28 = vsel %vm216_vm6, %v282_v26, 0.0 }
  0xd4   : > { %276 = vst [vmem:[#allocation2 + $0x18] sm:$0xf] %v273_v27  ;;  %v290_v29 = vrot.slane %v286_v28, 4 }
  0xd5   : > { %v244_v30 = vpop.permute.xlu1 %243  ;;  %v242_v31 = vpop.permute.xlu0 %241 }
  0xd6   : > { %295 = vst [vmem:[#allocation2 + $0x18] sm:$0xf0] %v290_v29  ;;  %v246_v32 = vsel %vm245_vm10, %v242_v31, %v244_v30  ;;  %250 = vst.msk [vmem:[#allocation2] sm:$0xf0] %vm249_vm11, %v242_v31  ;;  %v361_v49 = vld [vmem:[#allocation2 + $0x10] sm:$0xff] }
  0xd7   : > { %251 = vst [vmem:[#allocation2 + $0x8] sm:$0xf0] %v246_v32 }
  0xd9   : > { %v302_v33 = vpop.permute.xlu1 %301  ;;  %v300_v34 = vpop.permute.xlu0 %299 }
  0xda   : > { %v308_v35 = vsel %vm257_vm9, %v302_v33, 0.0  ;;  %v304_v36 = vsel %vm303_vm12, %v300_v34, %v302_v33 }
  0xdb   : > { %v312_v37 = vrot.slane %v308_v35, 4  ;;  %v307_v38 = vsel %vm256_vm3, %v304_v36, 0.0 }
  0xdc   : > { %v311_v39 = vrot.slane %v307_v38, 4 }
  0xdd   : > { %317 = vst.msk [vmem:[#allocation2 + $0x28] sm:$0xf0] %vm316_vm13, %v312_v37  ;;  %v321_v40 = vpop.permute.xlu1 %320  ;;  %v319_v41 = vpop.permute.xlu0 %318  ;;  %v362_v42 = vld [vmem:[#allocation2 + $0x18] sm:$0xff]  ;;  %v359_v43 = vld [vmem:[#allocation2] sm:$0xff] }
  0xde   : > { %315 = vst [vmem:[#allocation2 + $0x20] sm:$0xf0] %v311_v39  ;;  %v327_v44 = vsel %vm216_vm6, %v321_v40, 0.0  ;;  %v323_v45 = vsel %vm322_vm14, %v319_v41, %v321_v40  ;;  %v360_v46 = vld [vmem:[#allocation2 + $0x8] sm:$0xff]  ;;  %v609_v50 = vpack.c.bf16 %v361_v49, %v359_v43  ;;  %vm369_vm6 = vcmask 293888  }
  0xdf   : > { %330 = vst.msk [vmem:[#allocation2 + $0x38] sm:$0xf] %vm329_vm15, %v327_v44  ;;  %v326_v47 = vsel %vm215_vm0, %v323_v45, 0.0  ;;  %v607_v48 = vpack.c.bf16 %v362_v42, %v360_v46  ;;  %vm382_vm0 = vcmask 1043456  }
  0xe0   : > { %328 = vst [vmem:[#allocation2 + $0x30] sm:$0xf] %v326_v47 }
  0xe1   : > { %v334_v51 = vpop.permute.xlu1 %333  ;;  %608 = vmatprep.subr.bf16.mxu0 %v607_v48  ;;  %615 = vmatprep.subr.bf16.mxu1 %v607_v48  ;;  %v332_v52 = vpop.permute.xlu0 %331 }
  0xe2   : > { %341 = vst.msk [vmem:[#allocation2 + $0x38] sm:$0xf0] %vm340_vm1, %v334_v51  ;;  %v336_v53 = vsel %vm335_vm2, %v332_v52, %v334_v51  ;;  %610 = vmatpush1.bf16.msra.mxu0 %v609_v50  ;;  %618 = vmatpush1.bf16.msra.mxu1 %v609_v50 }
  0xe3   : > { %339 = vst [vmem:[#allocation2 + $0x30] sm:$0xf0] %v336_v53 }
  0xe4   : > { %v364_v59 = vld [vmem:[#allocation2 + $0x28] sm:$0xff] }
  0xe5   : > { %v345_v54 = vpop.permute.xlu1 %344  ;;  %v343_v55 = vpop.permute.xlu0 %342  ;;  %v363_v62 = vld [vmem:[#allocation2 + $0x20] sm:$0xff] }
  0xe6   : > { %v351_v56 = vsel %vm257_vm9, %v345_v54, 0.0  ;;  %v347_v57 = vsel %vm346_vm4, %v343_v55, %v345_v54 }
  0xe7   : > { %354 = vst.msk [vmem:[#allocation2 + $0x48] sm:$0xf] %vm353_vm5, %v351_v56  ;;  %v350_v58 = vsel %vm256_vm3, %v347_v57, 0.0 }
  0xe8   : > { %352 = vst [vmem:[#allocation2 + $0x40] sm:$0xf] %v350_v58 }
  0xe9   : > { %v366_v60 = vld [vmem:[#allocation2 + $0x38] sm:$0xff] }
  0xea   : > { %v611_v61 = vpack.c.bf16 %v366_v60, %v364_v59  ;;  %v365_v63 = vld [vmem:[#allocation2 + $0x30] sm:$0xff] }
  0xeb   : > { %v613_v1 = vpack.c.bf16 %v365_v63, %v363_v62 }
  0xec   : > { %612 = vmatprep.subr.bf16.mxu0 %v611_v61  ;;  %616 = vmatprep.subr.bf16.mxu1 %v611_v61 }
  0xed   : > { %614 = vmatpush1.bf16.msra.mxu0 %v613_v1  ;;  %619 = vmatpush1.bf16.msra.mxu1 %v613_v1 }
  0xee   : > { %v368_v2 = vld [vmem:[#allocation2 + $0x48] sm:$0xf] }
  0xef   : > { %594 = vmatprep.subr.msk.mxu0 %vm382_vm0, %v368_v2  ;;  %617 = vmatprep.subr.msk.mxu1 %vm382_vm0, %v368_v2  ;;  %v367_v3 = vld [vmem:[#allocation2 + $0x40] sm:$0xf] }
  0xf1   : > { %595 = vmatpush1.msk.msra.mxu0 %vm382_vm0, %v367_v3  ;;  %620 = vmatpush1.msk.msra.mxu1 %vm382_vm0, %v367_v3 }
  0xf2   : > { %596 = vmatmul.mubr.msk.f32.vlgmr.msra.gmra.mrb[0].mxu0 %vm369_vm6, %v355_v4  ;;  %598 = vmatmul.mubr.msk.f32.vlgmr.msra.gmra.mrb[0].mxu1 %vm369_vm6, %v357_v5 }
  0xf3   : > { %459 = vmatprep.mubr.f32.mxu0 %v826_v0  ;;  %471 = vmatprep.mubr.f32.mxu1 %v826_v0 }
  0xf6   : > { %597 = vmatmul.mubr.msk.f32.gmra.mrb[2].mxu0 %vm369_vm6, %v356_v6  ;;  %599 = vmatmul.mubr.msk.f32.gmra.mrb[2].mxu1 %vm369_vm6, %v358_v7 }
 0x1c5   : > { %v455_v8 = vpop.f32.mrb[0].mxu0  ;;  %v467_v9 = vpop.f32.mrb[0].mxu1 }
 0x1c6   : > { %478 = vst [vmem:[%s174_s5] sm:$0xff] %v455_v8  ;;  %482 = vst [vmem:[%s174_s5 + $0x20] sm:$0xff] %v467_v9  ;;  %v457_v10 = vpop.f32.mrb[1].mxu0  ;;  %v469_v11 = vpop.f32.mrb[1].mxu1 }
 0x1c7   : > { %479 = vst [vmem:[%s174_s5 + $0x8] sm:$0xff] %v457_v10  ;;  %483 = vst [vmem:[%s174_s5 + $0x28] sm:$0xff] %v469_v11 }
 0x1c9   : > { %v461_v0 = vpop.f32.mrb[2].mxu0  ;;  %v473_v12 = vpop.f32.mrb[2].mxu1 }
 0x1ca   : > { %480 = vst [vmem:[%s174_s5 + $0x10] sm:$0xff] %v461_v0  ;;  %484 = vst [vmem:[%s174_s5 + $0x30] sm:$0xff] %v473_v12  ;;  %v463_v13 = vpop.f32.mrb[3].mxu0  ;;  %v475_v14 = vpop.f32.mrb[3].mxu1 }
 0x1cb   : > { %481 = vst [vmem:[%s174_s5 + $0x18] sm:$0xff] %v463_v13  ;;  %485 = vst [vmem:[%s174_s5 + $0x38] sm:$0xff] %v475_v14 }
 0x1cc   : > { %763 = shalt.err (!%p760_p7)
}
 0x1cd   : > { %s764_s17 = scalar_lea.hbm %s1053_s25, 1024  ;;  %s768_s28 = scalar_lea.hbm %s1100_s2, 2048 }
 0x1ce   : > { %p765_p9 = scmp.ne.s32.totalorder %s1053_s25, %s764_s17  ;;  %p769_p0 = scmp.lt.u32.totalorder %s1053_s25, %s1100_s2 }
 0x1cf   : > { %p770_p1 = scmp.lt.u32.totalorder %s768_s28, %s764_s17  ;;  %p772_p4 = scmp.lt.u32.totalorder %s764_s17, %s1053_s25 }
 0x1d0   : > { %p766_p2 = pnand %p765_p9, %p943_p12 }
 0x1d1   : > { %p771_p11 = por %p770_p1, %p769_p0 }
 0x1d2   : > { %p767_p5 = pneg %p766_p2 }
 0x1d3   : > { %p773_p6 = por %p772_p4, %p771_p11 }
 0x1d5   : > { %p774_p8 = pnand %p773_p6, %p767_p5 }
 0x1d7   : > { %777 = shalt.err (!%p774_p8)
}
 0x1d8   : > { %s836_s4 = smov 256  }
 0x1d9   : > { %627 = dma.vmem_to_hbm [thread:$0]  (%p943_p12), %s1048_s6, 1024, %s1053_s25, %s487_s13, %s836_s4, %s836_s4, %s830_s22  }
 0x1da PF: > { %s515_s5 = sand.u32 1, %s808_s9   ;;  %p1115_p10 = scmp.ne.s32.totalorder %s1105_s16, 0 }
 0x1db   : > { %p1116_p13 = scmp.ge.s32.totalorder %s820_s12, 2  ;;  %s516_s7 = scalar_lea.sflag [#allocation5], %s515_s5 }
 0x1dd   : > { %p638_p3 = pnand %p1116_p13, %p1115_p10 }
 0x1df   : > { %803 = dma.done.wait (!%p638_p3), %s516_s7, 1024  }
 0x1e0   : > { %805 = vsyncadd (!%p638_p3), %s516_s7, 4294966272  ;;  %p16_p7 = scmp.ge.s32.totalorder %s908_s21, 4   ;;  %s1117_s9 = smov %s812_s10 }
 0x1e1   : > { %s1118_s10 = smov %s816_s11  ;;  %s1119_s11 = smov %s939_s8 }
 0x1e2   : > { %s1120_s12 = smov %s908_s21  ;;  %18 = sbr.rel (!%p16_p7) target bundleno = 6 (0x6), region = 77 }
 0x1e9   :  { %521 = vsyncpa [#allocation4], 1 }
 0x1ea   :  { %523 = vsyncpa [#allocation4 + $0x1], 1 }
 0x1eb   :  { %524 = vsyncpa [#allocation7], 1 }
 0x1ec   :  { %525 = vsyncpa [#allocation5], 1 }
 0x1ed   :  { %527 = vsyncpa [#allocation5 + $0x1], 1 }

</bundles_post_ra>
